<compile_context>
chip_gen: v5e
topology: v5e:2x2
jax: 0.10.0
libtpu: 0.0.40
codegen_flags: <defaults>
</compile_context>

<pallas_src>
import functools

import jax
import jax.numpy as jnp
from jax.experimental import pallas as pl
from jax.experimental.pallas import tpu as pltpu


# ---------------------------------------------------------------------------
# Kernels
# ---------------------------------------------------------------------------
def _pe_add_kernel(x_ref, pe_ref, o_ref):
    # x_ref: (TB, C) [or (TB, S, D)], pe_ref: (1, C) [or (S, D)] broadcast over rows.
    o_ref[...] = x_ref[...] + pe_ref[...]


def _pe_add_dropout_kernel(x_ref, pe_ref, bits_ref, o_ref, *, threshold, inv_keep):
    # Inverted dropout: keep iff bits >= threshold (threshold = round(p * 2^32));
    # kept values scaled by 1/(1-p). Integer compare + one select + one multiply.
    y = x_ref[...] + pe_ref[...]
    keep = bits_ref[...] >= jnp.uint32(threshold)
    o_ref[...] = jnp.where(keep, y * jnp.asarray(inv_keep, y.dtype), jnp.zeros_like(y))


# ---------------------------------------------------------------------------
# Parameter (buffer) construction — mirrors the PyTorch __init__
# ---------------------------------------------------------------------------
def make_positional_encoding(d_model, max_len=33, dtype=jnp.float32):
    position = jnp.arange(0, max_len, dtype=jnp.float32)[:, None]            # (max_len, 1)
    div_term = jnp.exp(
        jnp.arange(0, d_model, 2, dtype=jnp.float32) * (-jnp.log(10000.0) / d_model)
    )                                                                          # (d_model//2,)
    pe = jnp.zeros((max_len, d_model), dtype=jnp.float32)
    pe = pe.at[:, 0::2].set(jnp.sin(position * div_term))
    pe = pe.at[:, 1::2].set(jnp.cos(position * div_term))
    return pe.astype(dtype)                                                    # (max_len, d_model)


# ---------------------------------------------------------------------------
# Tiling helper: largest row-tile whose block fits a VMEM budget.
# ---------------------------------------------------------------------------
def _choose_row_tile(n_rows, row_bytes, budget_bytes=4 << 20, mult=1):
    """Returns n_rows when it fits the budget; otherwise the largest divisor of n_rows
    that is a multiple of `mult` (sublane constraint for 2-D blocks) and fits; else n_rows."""
    if n_rows * row_bytes <= budget_bytes:
        return n_rows
    max_rows = max(1, budget_bytes // row_bytes)
    for t in range(min(n_rows - 1, int(max_rows)), 0, -1):
        if n_rows % t == 0 and t % mult == 0:
            return t
    return n_rows


# ---------------------------------------------------------------------------
# Forward wrapper
# ---------------------------------------------------------------------------
def positional_encoding_forward(x, pe, *, p=0.1, training=False, key=None):
    B, S, D = x.shape
    dtype = x.dtype
    itemsize = jnp.dtype(dtype).itemsize
    pe_slice = pe[:S, :].astype(dtype)        # pe[:, :x.size(1), :] slice, cast once to x.dtype

    if (S * D) % 128 == 0:
        # Lane-dense 2-D layout: last dim S*D is a multiple of 128 -> unmasked stores.
        x_op = x.reshape(B, S * D)
        pe_op = pe_slice.reshape(1, S * D)
        R, C = x_op.shape
        tb = _choose_row_tile(R, C * itemsize, mult=8)
        grid = (R // tb,)
        x_spec = pl.BlockSpec((tb, C), lambda i: (i, 0))
        pe_spec = pl.BlockSpec((1, C), lambda i: (0, 0))
        out_shape = jax.ShapeDtypeStruct((R, C), dtype)
    else:
        # Fallback: (TB, S, D) blocks; last two dims are full-extent (always layout-legal).
        x_op, pe_op = x, pe_slice
        tb = _choose_row_tile(B, S * D * itemsize, mult=1)
        grid = (B // tb,)
        x_spec = pl.BlockSpec((tb, S, D), lambda i: (i, 0, 0))
        pe_spec = pl.BlockSpec((S, D), lambda i: (0, 0))
        out_shape = jax.ShapeDtypeStruct((B, S, D), dtype)

    cparams = pltpu.CompilerParams(
        dimension_semantics=("parallel",),     # megacore-shard the row loop (v7x: 2 TCs)
        vmem_limit_bytes=32 << 20,             # headroom for 6x pipelined block footprint
    )

    if (not training) or p <= 0.0:
        out = pl.pallas_call(
            _pe_add_kernel,
            out_shape=out_shape,
            grid=grid,
            in_specs=[x_spec, pe_spec],
            out_specs=x_spec,
            input_output_aliases={0: 0},
            compiler_params=cparams,
        )(x_op, pe_op)
        return out.reshape(B, S, D)

    # Training mode: dropout mask bits drawn with jax.random (portable across TPU and
    # interpret mode). PyTorch's exact RNG stream cannot be reproduced; semantics match:
    # each element kept with prob 1-p and scaled by 1/(1-p).
    if key is None:
        key = jax.random.PRNGKey(0)
    bits = jax.random.bits(key, (B, S, D), dtype=jnp.uint32).reshape(x_op.shape)
    threshold = min(int(round(float(p) * float(1 << 32))), (1 << 32) - 1)
    inv_keep = 1.0 / (1.0 - float(p))

    out = pl.pallas_call(
        functools.partial(_pe_add_dropout_kernel, threshold=threshold, inv_keep=inv_keep),
        out_shape=out_shape,
        grid=grid,
        in_specs=[x_spec, pe_spec, x_spec],   # bits reuse x's blocking (shape-only spec)
        out_specs=x_spec,
        input_output_aliases={0: 0},
        compiler_params=cparams,
    )(x_op, pe_op, bits)
    return out.reshape(B, S, D)


# ---------------------------------------------------------------------------
if __name__ == "__main__":
    B, S, D = 2, 8, 32
    MAX_LEN = 33
    P_DROP = 0.1

    key = jax.random.PRNGKey(0)
    x = jax.random.normal(key, (B, S, D), dtype=jnp.float32)
    pe = make_positional_encoding(D, max_len=MAX_LEN)
    ref = x + pe[:S, :][None, :, :]

    # eval-mode forward (dropout is identity, matches PyTorch .eval())
    y_eval = jax.block_until_ready(
        positional_encoding_forward(x, pe, p=P_DROP, training=False))
    assert y_eval.shape == (B, S, D)
    assert jnp.allclose(y_eval, ref, atol=1e-6, rtol=1e-6), "eval-mode mismatch"

    # training-mode forward (dropout mask from an explicit key)
    drop_key = jax.random.PRNGKey(1234)
    y_train = jax.block_until_ready(
        positional_encoding_forward(x, pe, p=P_DROP, training=True, key=drop_key))
    assert y_train.shape == (B, S, D)

    # Reproduce the mask host-side and compare.
    bits = jax.random.bits(drop_key, (B, S, D), dtype=jnp.uint32)
    threshold = min(int(round(P_DROP * float(1 << 32))), (1 << 32) - 1)
    keep = bits >= jnp.uint32(threshold)
    expected = jnp.where(keep, ref * (1.0 / (1.0 - P_DROP)), 0.0)
    assert jnp.allclose(y_train, expected, atol=1e-5, rtol=1e-5), "train-mode dropout mismatch"

    print("KERNEL_OK")
</pallas_src>

<mosaic_0001>
module attributes {stable_mosaic.version = 11 : i64} {
  func.func @_pe_add_kernel(%arg0: i32, %arg1: memref<2x256xf32, #tpu.memory_space<vmem>>, %arg2: memref<1x256xf32, #tpu.memory_space<vmem>>, %arg3: memref<2x256xf32, #tpu.memory_space<vmem>>) attributes {dimension_semantics = [#tpu.dimension_semantics<parallel>], iteration_bounds = array<i64: 1>, scalar_prefetch = 0 : i64, scratch_operands = 0 : i64, tpu.core_type = #tpu.core_type<tc>, window_params = [{transform_indices = @transform_0, window_bounds = array<i64: 2, 256>}, {pipeline_mode = #tpu.pipeline_mode<synchronous>, transform_indices = @transform_1, window_bounds = array<i64: 1, 256>}, {transform_indices = @transform_2, window_bounds = array<i64: 2, 256>}]} {
    %c0 = arith.constant 0 : index
    %c0_0 = arith.constant 0 : index
    %0 = vector.load %arg1[%c0, %c0_0] : memref<2x256xf32, #tpu.memory_space<vmem>>, vector<2x256xf32>
    %c0_1 = arith.constant 0 : index
    %c0_2 = arith.constant 0 : index
    %1 = vector.load %arg2[%c0_1, %c0_2] : memref<1x256xf32, #tpu.memory_space<vmem>>, vector<1x256xf32>
    %2 = vector.broadcast %1 : vector<1x256xf32> to vector<2x256xf32>
    %3 = arith.addf %0, %2 : vector<2x256xf32>
    %c0_3 = arith.constant 0 : index
    %c0_4 = arith.constant 0 : index
    %4 = vector.load %arg3[%c0_3, %c0_4] : memref<2x256xf32, #tpu.memory_space<vmem>>, vector<2x256xf32>
    tpu.vector_store %arg3[%c0_3, %c0_4], %3 {strides = array<i32>} : memref<2x256xf32, #tpu.memory_space<vmem>>, vector<2x256xf32>,
    return
  }
  func.func @transform_0(%arg0: i32) -> (i32, i32) {
    %c0_i32 = arith.constant 0 : i32
    %c0_i32_0 = arith.constant 0 : i32
    return %arg0, %c0_i32 : i32, i32
  }
  func.func @transform_1(%arg0: i32) -> (i32, i32) {
    %c0_i32 = arith.constant 0 : i32
    %c0_i32_0 = arith.constant 0 : i32
    %c0_i32_1 = arith.constant 0 : i32
    return %c0_i32, %c0_i32_0 : i32, i32
  }
  func.func @transform_2(%arg0: i32) -> (i32, i32) {
    %c0_i32 = arith.constant 0 : i32
    %c0_i32_0 = arith.constant 0 : i32
    return %arg0, %c0_i32 : i32, i32
  }
}

</mosaic_0001>

<bundles_post_ra>
// kernel: tpu_custom_call.1
= control target key start
LH: loop header
LB: loop body
LE: loop exit
PB: predicated region body
PF: predicated region fallthrough
CT: control target
= control target key end

     0   :  { %7 = vsyncpa [#allocation3], 0  ;;  %s134_s0 = inlined_call_operand.hbm [shape: f32[2,256], index: 0, kind: input, shape index: {}, may-alias: {0,2}]   ;;  %s135_s1 = inlined_call_operand.vmem [shape: f32[1,256], index: 1, kind: input, shape index: {}]   ;;  %s136_s2 = inlined_call_operand.hbm [shape: f32[2,256], index: 2, kind: output, shape index: {}, may-alias: {0,2}]  }
   0x1   :  { %8 = vsyncpa [#allocation4], 0  ;;  %s14_s11 = sshll.u32 %s134_s0, 4  ;;  %s108_s12 = smov [#allocation2]   ;;  %s15_s11 = int_to_ptr.hbm [resolvable:$true] %s14_s11 }
   0x2   :  { %s16_s13 = sshll.u32 %s108_s12, 4  ;;  %s17_s13 = int_to_ptr.vmem [resolvable:$true] %s16_s13 }
   0x3   :  { %19 = dma.hbm_to_vmem [thread:$0]  %s15_s11, 64, %s17_s13, [#allocation3]  }
   0x4   :  { %104 = dma.done.wait [#allocation3], 64  }
   0x5   :  { %105 = vsyncadd [#allocation3], 4294967232  ;;  %v27_v0 = vld [vmem:[%s135_s1] sm:$0x3]  ;;  %vm32_vm0 = vcmask 1041408   ;;  %s109_s16 = smov [#allocation5]  }
   0x6   :  { %v29_v1 = vperm.slane %v27_v0, 0  ;;  %v30_v2 = vperm.slane %v27_v0, 1  ;;  %v26_v3 = vld [vmem:[#allocation2] sm:$0xf]  ;;  %s42_s17 = sshll.u32 %s109_s16, 4  ;;  %s44_s19 = sshll.u32 %s136_s2, 4  ;;  %s43_s17 = int_to_ptr.vmem [resolvable:$true] %s42_s17  ;;  %s45_s19 = int_to_ptr.hbm [resolvable:$true] %s44_s19 }
   0x8   :  { %v31_v4 = vrot.slane %v30_v2, 6 }
   0xa   :  { %v33_v5 = vsel %vm32_vm0, %v29_v1, %v31_v4 }
   0xb   :  { %v35_v6 = vadd.f32 %v33_v5, %v26_v3 }
   0xd   :  { %36 = vst [vmem:[#allocation5] sm:$0xf] %v35_v6 }
   0xe   :  { %47 = dma.vmem_to_hbm [thread:$0]  %s43_s17, 64, %s45_s19, [#allocation4]  }
   0xf   :  { %106 = dma.done.wait [#allocation4], 64  }
  0x10   :  { %107 = vsyncadd [#allocation4], 4294967232 }
  0x11   :  { %52 = vsyncpa [#allocation3], 1 }
  0x12   :  { %53 = vsyncpa [#allocation4], 1 }

</bundles_post_ra>
